<compile_context>
chip_gen: v7x
topology: tpu7x:2x2x1
jax: 0.10.0
libtpu: 0.0.40
codegen_flags: <defaults>
</compile_context>

<pallas_src>
import functools

import jax
import jax.numpy as jnp
from jax.experimental import pallas as pl
from jax.experimental.pallas import tpu as pltpu


# ----------------------------------------------------------------------------
# Parameter setup (plain JAX glue).
# TODO(synk): compute_offset_scale_shift is not part of the provided snippet;
# this is a plausible deterministic re-implementation (scale ~= mult * shift_mult).
# ----------------------------------------------------------------------------
def compute_offset_scale_shift(zero_point, scale, num_bits_scale=1):
    shift_bits = 8 * num_bits_scale
    offset = zero_point.astype(jnp.float32)
    mult = jnp.round(scale.astype(jnp.float32) * (2.0 ** shift_bits))
    shift_mult = jnp.full_like(mult, 2.0 ** (-shift_bits))
    return offset, mult, shift_mult


# ----------------------------------------------------------------------------
# Pallas kernel: fused offset/scale + floor + single clamp.
# ----------------------------------------------------------------------------
def _add_relu_bias_kernel(y_ref, off_ref, scale_ref, o_ref, *, lo, hi):
    z = (y_ref[...] + off_ref[...]) * scale_ref[...]   # (rows, lanes) * (1, lanes)
    z = jnp.clip(jnp.floor(z), lo, hi)                 # folded clamp + relu + hardtanh
    o_ref[...] = z.astype(o_ref.dtype)


def add_relu_with_bias(y, bias, *, min_relu_clip, max_relu_clip,
                       scale, zero_point, with_relu=False, num_bits_scale=1,
                       out_dtype=jnp.float32,
                       block_rows_max=512, block_cols_max=1024):
    """JAX wrapper mirroring AddReLUWithBias.forward (y is (N, C) float32)."""
    del bias  # stored in the torch module but unused in forward()
    if with_relu:
        quant_min, quant_max = -max_relu_clip, max_relu_clip
    else:
        quant_min, quant_max = -128, 127

    offset, mult, shift_mult = compute_offset_scale_shift(
        zero_point, scale, num_bits_scale=num_bits_scale)
    # Fold shift_mult (a power of two) into mult on the host: bit-exact and
    # drops one input stream + one multiply per element in the kernel.
    comb_scale = mult * shift_mult

    # Fold clamp(quant_min, quant_max) -> relu -> hardtanh into one clip.
    # Composition of monotone clamps == clip(z, lo, hi) with:
    if with_relu:
        lo = min(max(max(float(quant_min), 0.0), float(min_relu_clip)),
                 float(max_relu_clip))
        hi = min(max(max(float(quant_max), 0.0), float(min_relu_clip)),
                 float(max_relu_clip))
    else:
        lo, hi = float(quant_min), float(quant_max)

    N, C = y.shape
    offset = offset.reshape(1, C).astype(jnp.float32)
    comb_scale = comb_scale.reshape(1, C).astype(jnp.float32)

    # Lane-dense repack for small C: pack 128 // C rows into the lane dim so
    # stores are full-lane (unmasked) instead of masked partial stores.
    repack = (C < 128) and (128 % C == 0) and ((N * C) % 128 == 0)
    if repack:
        rep = 128 // C
        y2 = y.reshape((N * C) // 128, 128)
        off2 = jnp.tile(offset, (1, rep))
        scale2 = jnp.tile(comb_scale, (1, rep))
    else:
        y2, off2, scale2 = y, offset, comb_scale

    R, L = y2.shape

    # Tile sizes: obey the (8, 128) rule (block dim divisible by 8/128 or equal
    # to the full extent). Tiles of <= (512, 1024) f32 stay far below even the
    # 16 MiB v5e scoped-VMEM default with double buffering.
    if R % 8 == 0 and R > block_rows_max:
        block_rows = block_rows_max
    else:
        block_rows = R
    if L % 128 == 0 and L > block_cols_max:
        block_cols = block_cols_max
    else:
        block_cols = L

    grid = (pl.cdiv(R, block_rows), pl.cdiv(L, block_cols))

    kernel = functools.partial(_add_relu_bias_kernel, lo=lo, hi=hi)

    out = pl.pallas_call(
        kernel,
        out_shape=jax.ShapeDtypeStruct((R, L), out_dtype),
        grid=grid,
        in_specs=[
            pl.BlockSpec((block_rows, block_cols), lambda i, j: (i, j)),
            # per-channel params: constant block index along the row axis so
            # they stay resident in VMEM across row tiles.
            pl.BlockSpec((1, block_cols), lambda i, j: (0, j)),
            pl.BlockSpec((1, block_cols), lambda i, j: (0, j)),
        ],
        out_specs=pl.BlockSpec((block_rows, block_cols), lambda i, j: (i, j)),
        compiler_params=pltpu.CompilerParams(
            dimension_semantics=("parallel", "parallel")),
    )(y2, off2, scale2)

    if repack:
        out = out.reshape(N, C)
    return out


# ----------------------------------------------------------------------------
# Pure-JAX reference for verification (un-fused, original op order).
# ----------------------------------------------------------------------------
def _reference(y, *, min_relu_clip, max_relu_clip, scale, zero_point,
               with_relu, num_bits_scale):
    if with_relu:
        quant_min, quant_max = -max_relu_clip, max_relu_clip
    else:
        quant_min, quant_max = -128, 127
    offset, mult, shift_mult = compute_offset_scale_shift(
        zero_point, scale, num_bits_scale=num_bits_scale)
    offset, mult, shift_mult = (a.reshape(1, -1) for a in (offset, mult, shift_mult))
    z = (y + offset) * mult
    z = z * shift_mult
    z = jnp.clip(jnp.floor(z), quant_min, quant_max)
    if with_relu:
        z = jnp.maximum(z, 0.0)
        z = jnp.clip(z, min_relu_clip, max_relu_clip)
    return z


if __name__ == "__main__":
    key = jax.random.PRNGKey(0)

    # --- Test 1: small C (lane-dense repack path), with ReLU -----------------
    k_y, k_s, k_zp, k_b = jax.random.split(key, 4)
    N, C = 8, 32
    y = jnp.round(jax.random.normal(k_y, (N, C), dtype=jnp.float32) * 200.0)
    scale = jax.random.uniform(k_s, (C,), dtype=jnp.float32, minval=0.01, maxval=0.5)
    zero_point = jnp.round(
        jax.random.uniform(k_zp, (C,), dtype=jnp.float32, minval=-8.0, maxval=8.0))
    bias = jax.random.normal(k_b, (C,), dtype=jnp.float32)  # unused in forward

    cfg = dict(min_relu_clip=0, max_relu_clip=127,
               scale=scale, zero_point=zero_point,
               with_relu=True, num_bits_scale=1)
    out = jax.block_until_ready(add_relu_with_bias(y, bias, **cfg))
    ref = _reference(y, **cfg)
    assert out.shape == (N, C) and out.dtype == jnp.float32
    assert jnp.allclose(out, ref, atol=0.0), "mismatch vs reference (test 1)"

    # --- Test 2: wide C (tiled grid path, no repack), no ReLU ----------------
    k_y2, k_s2, k_zp2 = jax.random.split(jax.random.PRNGKey(1), 3)
    N2, C2 = 1024, 256
    y2 = jnp.round(jax.random.normal(k_y2, (N2, C2), dtype=jnp.float32) * 200.0)
    scale2 = jax.random.uniform(k_s2, (C2,), dtype=jnp.float32, minval=0.01, maxval=0.5)
    zp2 = jnp.round(
        jax.random.uniform(k_zp2, (C2,), dtype=jnp.float32, minval=-8.0, maxval=8.0))
    cfg2 = dict(min_relu_clip=0, max_relu_clip=127,
                scale=scale2, zero_point=zp2,
                with_relu=False, num_bits_scale=1)
    out2 = jax.block_until_ready(
        add_relu_with_bias(y2, jnp.zeros((C2,), jnp.float32), **cfg2))
    ref2 = _reference(y2, **cfg2)
    assert out2.shape == (N2, C2)
    assert jnp.allclose(out2, ref2, atol=0.0), "mismatch vs reference (test 2)"

    print("KERNEL_OK")
</pallas_src>

<mosaic_0001>
module attributes {stable_mosaic.version = 11 : i64} {
  func.func @_add_relu_bias_kernel(%arg0: i32, %arg1: i32, %arg2: memref<2x128xf32, #tpu.memory_space<vmem>>, %arg3: memref<1x128xf32, #tpu.memory_space<vmem>>, %arg4: memref<1x128xf32, #tpu.memory_space<vmem>>, %arg5: memref<2x128xf32, #tpu.memory_space<vmem>>) attributes {dimension_semantics = [#tpu.dimension_semantics<parallel>, #tpu.dimension_semantics<parallel>], iteration_bounds = array<i64: 1, 1>, scalar_prefetch = 0 : i64, scratch_operands = 0 : i64, tpu.core_type = #tpu.core_type<tc>, window_params = [{transform_indices = @transform_0, window_bounds = array<i64: 2, 128>}, {transform_indices = @transform_1, window_bounds = array<i64: 1, 128>}, {transform_indices = @transform_2, window_bounds = array<i64: 1, 128>}, {transform_indices = @transform_3, window_bounds = array<i64: 2, 128>}]} {
    %c0 = arith.constant 0 : index
    %c0_0 = arith.constant 0 : index
    %0 = vector.load %arg2[%c0, %c0_0] : memref<2x128xf32, #tpu.memory_space<vmem>>, vector<2x128xf32>
    %c0_1 = arith.constant 0 : index
    %c0_2 = arith.constant 0 : index
    %1 = vector.load %arg3[%c0_1, %c0_2] : memref<1x128xf32, #tpu.memory_space<vmem>>, vector<1x128xf32>
    %2 = vector.broadcast %1 : vector<1x128xf32> to vector<2x128xf32>
    %3 = arith.addf %0, %2 : vector<2x128xf32>
    %c0_3 = arith.constant 0 : index
    %c0_4 = arith.constant 0 : index
    %4 = vector.load %arg4[%c0_3, %c0_4] : memref<1x128xf32, #tpu.memory_space<vmem>>, vector<1x128xf32>
    %5 = vector.broadcast %4 : vector<1x128xf32> to vector<2x128xf32>
    %6 = arith.mulf %3, %5 : vector<2x128xf32>
    %7 = math.floor %6 : vector<2x128xf32>
    %cst = arith.constant 0.000000e+00 : f32
    %cst_5 = arith.constant 1.270000e+02 : f32
    %8 = vector.broadcast %cst : f32 to vector<2x128xf32>
    %9 = arith.maximumf %8, %7 : vector<2x128xf32>
    %10 = vector.broadcast %cst_5 : f32 to vector<2x128xf32>
    %11 = arith.minimumf %10, %9 : vector<2x128xf32>
    %c0_6 = arith.constant 0 : index
    %c0_7 = arith.constant 0 : index
    %12 = vector.load %arg5[%c0_6, %c0_7] : memref<2x128xf32, #tpu.memory_space<vmem>>, vector<2x128xf32>
    tpu.vector_store %arg5[%c0_6, %c0_7], %11 {strides = array<i32>} : memref<2x128xf32, #tpu.memory_space<vmem>>, vector<2x128xf32>,
    return
  }
  func.func @transform_0(%arg0: i32, %arg1: i32) -> (i32, i32) {
    %c0_i32 = arith.constant 0 : i32
    return %arg0, %arg1 : i32, i32
  }
  func.func @transform_1(%arg0: i32, %arg1: i32) -> (i32, i32) {
    %c0_i32 = arith.constant 0 : i32
    %c0_i32_0 = arith.constant 0 : i32
    return %c0_i32, %arg1 : i32, i32
  }
  func.func @transform_2(%arg0: i32, %arg1: i32) -> (i32, i32) {
    %c0_i32 = arith.constant 0 : i32
    %c0_i32_0 = arith.constant 0 : i32
    return %c0_i32, %arg1 : i32, i32
  }
  func.func @transform_3(%arg0: i32, %arg1: i32) -> (i32, i32) {
    %c0_i32 = arith.constant 0 : i32
    return %arg0, %arg1 : i32, i32
  }
}

</mosaic_0001>

<bundles_post_ra>
// kernel: tpu_custom_call.1
= control target key start
LH: loop header
LB: loop body
LE: loop exit
PB: predicated region body
PF: predicated region fallthrough
CT: control target
= control target key end

     0   :  { %8 = vsyncpa [#allocation3], 0  ;;  %s167_s0 = inlined_call_operand.hbm [shape: f32[2,128], index: 0, kind: input, shape index: {}]   ;;  %s168_s1 = inlined_call_operand.vmem [shape: f32[1,128], index: 1, kind: input, shape index: {}]   ;;  %s169_s2 = inlined_call_operand.vmem [shape: f32[1,128], index: 2, kind: input, shape index: {}]   ;;  %s170_s3 = inlined_call_operand.hbm [shape: f32[2,128], index: 3, kind: output, shape index: {}]  }
   0x1   :  { %9 = vsyncpa [#allocation4], 0  ;;  %s115_s12 = smov [#allocation2]   ;;  %s67_s16 = scalar_lea.hbm %s167_s0, 32 }
   0x2   :  { %s16_s13 = sshll.u32 %s115_s12, 4  ;;  %p68_p0 = scmp.ne.s32.totalorder %s167_s0, %s67_s16  ;;  %s17_s13 = int_to_ptr.vmem [resolvable:$true] %s16_s13 }
   0x3   :  { %p71_p1 = scmp.lt.u32.totalorder %s67_s16, %s167_s0 }
   0x5   :  { %p73_p2 = pnand %p71_p1, %p68_p0 }
   0x7   :  { %76 = shalt.err (!%p73_p2)
}
   0x8   :  { %s77_s21 = scalar_lea.vmem %s17_s13, 32  ;;  %p82_p4 = scmp.lt.s32.totalorder %s17_s13, %s17_s13 }
   0x9   :  { %p78_p3 = scmp.ne.s32.totalorder %s17_s13, %s77_s21  ;;  %p83_p5 = scmp.lt.s32.totalorder %s77_s21, %s77_s21 }
   0xb   :  { %p84_p6 = por %p83_p5, %p82_p4 }
   0xd   :  { %p85_p7 = pnand %p84_p6, %p78_p3 }
   0xf   :  { %88 = shalt.err (!%p85_p7)
}
  0x10   :  { %19 = dma.hbm_to_vmem [thread:$0]  %s167_s0, 32, %s17_s13, [#allocation3]  }
  0x11   :  { %111 = dma.done.wait [#allocation3], 32  }
  0x12   :  { %112 = vsyncadd [#allocation3], 4294967264  ;;  %v27_v0 = vld [vmem:[#allocation2] sm:$0x3]  ;;  %s116_s28 = smov [#allocation5]  }
  0x13   :  { %v63_v1 = vld [vmem:[%s168_s1] ss:$0 sm:$0xff]  ;;  %s54_s29 = sshll.u32 %s116_s28, 4  ;;  %s55_s29 = int_to_ptr.vmem [resolvable:$true] %s54_s29 }
  0x14   :  { %v64_v2 = vld [vmem:[%s169_s2] ss:$0 sm:$0xff]  ;;  %v35_v3 = vadd.f32 %v63_v1, %v27_v0  ;;  %s89_s0 = scalar_lea.vmem %s55_s29, 32  ;;  %p94_p9 = scmp.lt.s32.totalorder %s55_s29, %s55_s29 }
  0x15   :  { %p90_p8 = scmp.ne.s32.totalorder %s55_s29, %s89_s0  ;;  %p95_p10 = scmp.lt.s32.totalorder %s89_s0, %s89_s0 }
  0x16   :  { %v43_v4 = vmul.f32 %v64_v2, %v35_v3 }
  0x17   :  { %p96_p11 = por %p95_p10, %p94_p9 }
  0x18   :  { %v44_v5 = vfloor.f32 %v43_v4 }
  0x19   :  { %p97_p12 = pnand %p96_p11, %p90_p8 }
  0x1a   :  { %v45_v6 = vmax.f32 %v44_v5, 0.0 }
  0x1c   :  { %v46_v7 = vmin.f32 %v45_v6, 127.0 }
  0x1e   :  { %47 = vst [vmem:[#allocation5] sm:$0x3] %v46_v7 }
  0x1f   :  { %100 = shalt.err (!%p97_p12)
}
  0x20   :  { %s101_s2 = scalar_lea.hbm %s170_s3, 32 }
  0x21   :  { %p102_p13 = scmp.ne.s32.totalorder %s170_s3, %s101_s2  ;;  %p105_p0 = scmp.lt.u32.totalorder %s101_s2, %s170_s3 }
  0x23   :  { %p107_p1 = pnand %p105_p0, %p102_p13 }
  0x25   :  { %110 = shalt.err (!%p107_p1)
}
  0x26   :  { %57 = dma.vmem_to_hbm [thread:$0]  %s55_s29, 32, %s170_s3, [#allocation4]  }
  0x27   :  { %113 = dma.done.wait [#allocation4], 32  }
  0x28   :  { %114 = vsyncadd [#allocation4], 4294967264 }
  0x29   :  { %61 = vsyncpa [#allocation3], 1 }
  0x2a   :  { %62 = vsyncpa [#allocation4], 1 }

</bundles_post_ra>
